<compile_context>
chip_gen: v6e
topology: v6e:2x2x1
jax: 0.10.0
libtpu: 0.0.40
codegen_flags: <defaults>
</compile_context>

<pallas_src>
import functools
import math

import jax
import jax.numpy as jnp
from jax import lax
from jax.experimental import pallas as pl
from jax.experimental.pallas import tpu as pltpu

LN_EPS = 1e-5
MASK_VALUE = -1e30


def _layernorm(x, gamma, beta):
    # x: (T, C) f32, gamma/beta: (1, C) f32
    mean = jnp.mean(x, axis=-1, keepdims=True)
    xc = x - mean
    var = jnp.mean(xc * xc, axis=-1, keepdims=True)
    return xc * lax.rsqrt(var + LN_EPS) * gamma + beta


def _gelu_tanh(x):
    # matches torch.nn.GELU(approximate='tanh')
    c = 0.7978845608028654  # sqrt(2/pi)
    return 0.5 * x * (1.0 + jnp.tanh(c * (x + 0.044715 * x * x * x)))


# --------------------------------------------------------------------------------------
# Kernel 1: LN1 + fused QKV projection (runs once per token tile; writes head-major bf16)
# --------------------------------------------------------------------------------------
def qkv_kernel(x_ref, ln1_g_ref, ln1_b_ref, w_qkv_ref, b_qkv_ref,
               q_ref, k_ref, v_ref, *, n_head, scale):
    F32 = jnp.float32
    BF16 = jnp.bfloat16

    x = x_ref[...]                                     # (Tt, C) f32
    _, C = x.shape
    hd = C // n_head

    h1 = _layernorm(x, ln1_g_ref[...], ln1_b_ref[...])
    qkv = jnp.dot(h1.astype(BF16), w_qkv_ref[...],
                  preferred_element_type=F32) + b_qkv_ref[...]   # (Tt, 3C) f32

    # Head-major outputs: q/k/v refs have shape (n_head, Tt, hd).
    # 1/sqrt(hd) folded into q once, before the bf16 cast.
    for h in range(n_head):
        q_ref[h] = (qkv[:, h * hd:(h + 1) * hd] * scale).astype(BF16)
        k_ref[h] = qkv[:, C + h * hd: C + (h + 1) * hd].astype(BF16)
        v_ref[h] = qkv[:, 2 * C + h * hd: 2 * C + (h + 1) * hd].astype(BF16)


# --------------------------------------------------------------------------------------
# Kernel 2: flash attention (causal tile skip) + residual + LN2 + MLP + residual
# --------------------------------------------------------------------------------------
def attn_mlp_kernel(x_ref, q_ref, k_ref, v_ref,
                    w_ao_ref, b_ao_ref,
                    ln2_g_ref, ln2_b_ref,
                    w_fc_ref, b_fc_ref,
                    w_mo_ref, b_mo_ref,
                    out_ref, y_scr,
                    *, n_head, mlp_chunk):
    F32 = jnp.float32
    BF16 = jnp.bfloat16

    qi = pl.program_id(1)                      # query-tile index
    NH, TQ, HD = q_ref.shape                   # head-major Q tile
    C = x_ref.shape[-1]
    TK = TQ                                    # KV tile size == query tile size

    q = q_ref[...]                             # (NH, TQ, HD) bf16

    def attend(j, carry, apply_mask):
        m, l, acc = carry
        start = pl.multiple_of(j * TK, TK)
        k_t = k_ref[:, pl.ds(start, TK), :]    # (NH, TK, HD) bf16
        v_t = v_ref[:, pl.ds(start, TK), :]
        s = jnp.einsum('hqd,hkd->hqk', q, k_t,
                       preferred_element_type=F32)        # (NH, TQ, TK) f32
        if apply_mask:                          # only on the diagonal tile
            row = lax.broadcasted_iota(jnp.int32, (TQ, TK), 0)
            col = lax.broadcasted_iota(jnp.int32, (TQ, TK), 1)
            s = jnp.where((row >= col)[None, :, :], s, F32(MASK_VALUE))
        m_new = jnp.maximum(m, jnp.max(s, axis=-1, keepdims=True))
        alpha = jnp.exp(m - m_new)
        p = jnp.exp(s - m_new)
        l_new = alpha * l + jnp.sum(p, axis=-1, keepdims=True)
        acc_new = alpha * acc + jnp.einsum('hqk,hkd->hqd', p.astype(BF16), v_t,
                                           preferred_element_type=F32)
        return m_new, l_new, acc_new

    init = (jnp.full((NH, TQ, 1), MASK_VALUE, F32),   # running max
            jnp.zeros((NH, TQ, 1), F32),              # running denom
            jnp.zeros((NH, TQ, HD), F32))             # running numerator
    # Strictly-below-diagonal KV tiles: no mask / iota / select at all.
    carry = lax.fori_loop(0, qi, lambda j, c: attend(j, c, False), init)
    # Diagonal tile: causal mask applied.
    _, l, acc = attend(qi, carry, True)

    # ---- normalize & pack heads -> single C-deep output projection ----
    y = acc * pl.reciprocal(l, approx=True)           # (NH, TQ, HD) f32
    for h in range(n_head):
        y_scr[:, h * HD:(h + 1) * HD] = y[h].astype(BF16)
    attn = jnp.dot(y_scr[...], w_ao_ref[...], preferred_element_type=F32)
    x1 = x_ref[...] + attn + b_ao_ref[...]             # residual 1

    # ---- ln_2 + MLP (<=4 statically-unrolled hidden chunks, static lane slices) ----
    h2 = _layernorm(x1, ln2_g_ref[...], ln2_b_ref[...]).astype(BF16)
    H = w_fc_ref.shape[1]                               # 4*C
    mlp = jnp.zeros((TQ, C), F32)
    for c0 in range(0, H, mlp_chunk):
        hc = jnp.dot(h2, w_fc_ref[:, c0:c0 + mlp_chunk],
                     preferred_element_type=F32) + b_fc_ref[:, c0:c0 + mlp_chunk]
        hc = _gelu_tanh(hc)                             # f32
        mlp = mlp + jnp.dot(hc.astype(BF16), w_mo_ref[c0:c0 + mlp_chunk, :],
                            preferred_element_type=F32)
    out_ref[...] = (x1 + mlp + b_mo_ref[...]).astype(out_ref.dtype)   # residual 2


# --------------------------------------------------------------------------------------
# Wrapper
# --------------------------------------------------------------------------------------
def prepare_block_params(params):
    """One-time bf16 cast of the matmul weights (avoid per-call .astype HBM traffic)."""
    bf = jnp.bfloat16
    f32 = jnp.float32
    return {
        "ln1_g": params["ln1_g"].astype(f32),
        "ln1_b": params["ln1_b"].astype(f32),
        "w_qkv": params["w_qkv"].astype(bf),
        "b_qkv": params["b_qkv"].astype(f32),
        "w_attn_proj": params["w_attn_proj"].astype(bf),
        "b_attn_proj": params["b_attn_proj"].astype(f32),
        "ln2_g": params["ln2_g"].astype(f32),
        "ln2_b": params["ln2_b"].astype(f32),
        "w_fc": params["w_fc"].astype(bf),
        "b_fc": params["b_fc"].astype(f32),
        "w_mlp_proj": params["w_mlp_proj"].astype(bf),
        "b_mlp_proj": params["b_mlp_proj"].astype(f32),
    }


def _const_spec(shape):
    """BlockSpec for a weight that is identical for every grid step (single buffered)."""
    imap = lambda *_: (0,) * len(shape)
    try:
        return pl.BlockSpec(shape, imap, pipeline_mode=pl.Buffered(1))
    except TypeError:  # older Pallas without pipeline_mode
        return pl.BlockSpec(shape, imap)


def _vmem_limit_bytes():
    try:
        cap = int(pltpu.get_tpu_info().vmem_capacity_bytes)
    except Exception:
        cap = 128 * 1024 * 1024
    # leave headroom for compiler-internal scratch / spills
    return int(min(cap * 3 // 4, 100 * 1024 * 1024))


def gpt_block_forward(x, params, n_head, *, tq=None, mlp_chunk=None):
    B, T, C = x.shape
    assert C % n_head == 0
    hd = C // n_head
    if tq is None:
        tq = min(T, 128)          # raise to 256 on v6e once VMEM allows
    assert T % tq == 0
    nq = T // tq
    H = params["w_fc"].shape[1]
    if mlp_chunk is None:
        n_chunks = 1
        for cand in (4, 3, 2):    # keep unroll count <= 4, chunk >= 128 lanes
            if H % cand == 0 and H // cand >= 128:
                n_chunks = cand
                break
        mlp_chunk = H // n_chunks
    assert H % mlp_chunk == 0

    bf = jnp.bfloat16
    scale = 1.0 / math.sqrt(hd)
    vmem_limit = _vmem_limit_bytes()

    # ---------------- pass 1: LN1 + QKV projection (once per token) ----------------
    head_arr = jax.ShapeDtypeStruct((B, n_head, T, hd), bf)
    head_tile_spec = pl.BlockSpec((None, n_head, tq, hd), lambda b, t: (b, 0, t, 0))

    q_all, k_all, v_all = pl.pallas_call(
        functools.partial(qkv_kernel, n_head=n_head, scale=scale),
        out_shape=(head_arr, head_arr, head_arr),
        grid_spec=pltpu.PrefetchScalarGridSpec(
            num_scalar_prefetch=0,
            grid=(B, nq),
            in_specs=[
                pl.BlockSpec((None, tq, C), lambda b, t: (b, t, 0)),
                _const_spec(params["ln1_g"].shape),
                _const_spec(params["ln1_b"].shape),
                _const_spec(params["w_qkv"].shape),
                _const_spec(params["b_qkv"].shape),
            ],
            out_specs=[head_tile_spec, head_tile_spec, head_tile_spec],
        ),
        compiler_params=pltpu.CompilerParams(
            dimension_semantics=("parallel", "parallel"),
            vmem_limit_bytes=vmem_limit,
        ),
    )(x, params["ln1_g"], params["ln1_b"], params["w_qkv"], params["b_qkv"])

    # ---------------- pass 2: flash attention + residual + LN2 + MLP ----------------
    # NOTE: with B leading the parallel grid the v7x 2-TC split is balanced; if B were
    # 1/odd, pair query tiles (qi, nq-1-qi) in the index maps to equalize causal work.
    return pl.pallas_call(
        functools.partial(attn_mlp_kernel, n_head=n_head, mlp_chunk=mlp_chunk),
        out_shape=jax.ShapeDtypeStruct((B, T, C), x.dtype),
        grid_spec=pltpu.PrefetchScalarGridSpec(
            num_scalar_prefetch=0,
            grid=(B, nq),
            in_specs=[
                pl.BlockSpec((None, tq, C), lambda b, q: (b, q, 0)),               # x tile
                pl.BlockSpec((None, n_head, tq, hd), lambda b, q: (b, 0, q, 0)),   # Q tile
                pl.BlockSpec((None, n_head, T, hd), lambda b, q: (b, 0, 0, 0)),    # K (bf16)
                pl.BlockSpec((None, n_head, T, hd), lambda b, q: (b, 0, 0, 0)),    # V (bf16)
                _const_spec(params["w_attn_proj"].shape),
                _const_spec(params["b_attn_proj"].shape),
                _const_spec(params["ln2_g"].shape),
                _const_spec(params["ln2_b"].shape),
                _const_spec(params["w_fc"].shape),
                _const_spec(params["b_fc"].shape),
                _const_spec(params["w_mlp_proj"].shape),
                _const_spec(params["b_mlp_proj"].shape),
            ],
            out_specs=pl.BlockSpec((None, tq, C), lambda b, q: (b, q, 0)),
            scratch_shapes=[pltpu.VMEM((tq, C), jnp.bfloat16)],
        ),
        compiler_params=pltpu.CompilerParams(
            dimension_semantics=("parallel", "parallel"),
            vmem_limit_bytes=vmem_limit,
        ),
    )(x, q_all, k_all, v_all,
      params["w_attn_proj"], params["b_attn_proj"],
      params["ln2_g"], params["ln2_b"],
      params["w_fc"], params["b_fc"],
      params["w_mlp_proj"], params["b_mlp_proj"])


# ---------------- pure-JAX reference (f32, for verification) ----------------
def reference_block(x, p, n_head):
    def ln(x, g, b):
        m = jnp.mean(x, axis=-1, keepdims=True)
        v = jnp.mean((x - m) ** 2, axis=-1, keepdims=True)
        return (x - m) / jnp.sqrt(v + LN_EPS) * g + b

    B, T, C = x.shape
    hd = C // n_head
    h = ln(x, p["ln1_g"], p["ln1_b"])
    qkv = h @ p["w_qkv"] + p["b_qkv"]
    q, k, v = jnp.split(qkv, 3, axis=-1)
    q = q.reshape(B, T, n_head, hd).transpose(0, 2, 1, 3)
    k = k.reshape(B, T, n_head, hd).transpose(0, 2, 1, 3)
    v = v.reshape(B, T, n_head, hd).transpose(0, 2, 1, 3)
    s = jnp.einsum("bhqd,bhkd->bhqk", q, k) / math.sqrt(hd)
    mask = jnp.tril(jnp.ones((T, T), bool))
    s = jnp.where(mask, s, -1e30)
    a = jax.nn.softmax(s, axis=-1)
    y = jnp.einsum("bhqk,bhkd->bhqd", a, v).transpose(0, 2, 1, 3).reshape(B, T, C)
    x = x + (y @ p["w_attn_proj"] + p["b_attn_proj"])
    h = ln(x, p["ln2_g"], p["ln2_b"])
    h = h @ p["w_fc"] + p["b_fc"]
    c = 0.7978845608028654
    h = 0.5 * h * (1.0 + jnp.tanh(c * (h + 0.044715 * h ** 3)))
    return x + (h @ p["w_mlp_proj"] + p["b_mlp_proj"])


def make_params(key, n_embd):
    ks = jax.random.split(key, 8)
    s = 0.02
    return {
        "ln1_g": jnp.ones((1, n_embd), jnp.float32),
        "ln1_b": jnp.zeros((1, n_embd), jnp.float32),
        "w_qkv": s * jax.random.normal(ks[0], (n_embd, 3 * n_embd), jnp.float32),
        "b_qkv": s * jax.random.normal(ks[1], (1, 3 * n_embd), jnp.float32),
        "w_attn_proj": s * jax.random.normal(ks[2], (n_embd, n_embd), jnp.float32),
        "b_attn_proj": s * jax.random.normal(ks[3], (1, n_embd), jnp.float32),
        "ln2_g": jnp.ones((1, n_embd), jnp.float32),
        "ln2_b": jnp.zeros((1, n_embd), jnp.float32),
        "w_fc": s * jax.random.normal(ks[4], (n_embd, 4 * n_embd), jnp.float32),
        "b_fc": s * jax.random.normal(ks[5], (1, 4 * n_embd), jnp.float32),
        "w_mlp_proj": s * jax.random.normal(ks[6], (4 * n_embd, n_embd), jnp.float32),
        "b_mlp_proj": s * jax.random.normal(ks[7], (1, n_embd), jnp.float32),
    }


if __name__ == "__main__":
    # Small GPT block.  T=32 with tq=8 exercises 4 query tiles (multi-KV-tile flash
    # path, causal tile skip, diagonal masking); mlp_chunk=64 exercises 2 MLP chunks.
    B, T, C, n_head = 2, 32, 32, 4

    key = jax.random.PRNGKey(0)
    kx, kp = jax.random.split(key)
    x = jax.random.normal(kx, (B, T, C), jnp.float32)
    params = make_params(kp, C)
    prepped = prepare_block_params(params)

    out = jax.block_until_ready(
        gpt_block_forward(x, prepped, n_head, tq=8, mlp_chunk=64))
    ref = reference_block(x, params, n_head)

    assert out.shape == (B, T, C)
    err = float(jnp.max(jnp.abs(out - ref)))
    # bf16 matmul inputs + approx reciprocal vs f32 reference -> small bounded deviation
    assert err < 2e-2, f"mismatch vs reference: max abs err = {err}"
    print("KERNEL_OK")
</pallas_src>

<mosaic_0001>
module attributes {stable_mosaic.version = 11 : i64} {
  func.func @qkv_kernel(%arg0: i32, %arg1: i32, %arg2: memref<1x8x32xf32, #tpu.memory_space<vmem>>, %arg3: memref<1x32xf32, #tpu.memory_space<vmem>>, %arg4: memref<1x32xf32, #tpu.memory_space<vmem>>, %arg5: memref<32x96xbf16, #tpu.memory_space<vmem>>, %arg6: memref<1x96xf32, #tpu.memory_space<vmem>>, %arg7: memref<1x4x8x8xbf16, #tpu.memory_space<vmem>>, %arg8: memref<1x4x8x8xbf16, #tpu.memory_space<vmem>>, %arg9: memref<1x4x8x8xbf16, #tpu.memory_space<vmem>>) attributes {dimension_semantics = [#tpu.dimension_semantics<parallel>, #tpu.dimension_semantics<parallel>], iteration_bounds = array<i64: 2, 4>, scalar_prefetch = 0 : i64, scratch_operands = 0 : i64, tpu.core_type = #tpu.core_type<tc>, window_params = [{transform_indices = @transform_0, window_bounds = array<i64: 1, 8, 32>}, {pipeline_mode = #tpu.pipeline_mode<synchronous>, transform_indices = @transform_1, window_bounds = array<i64: 1, 32>}, {pipeline_mode = #tpu.pipeline_mode<synchronous>, transform_indices = @transform_2, window_bounds = array<i64: 1, 32>}, {pipeline_mode = #tpu.pipeline_mode<synchronous>, transform_indices = @transform_3, window_bounds = array<i64: 32, 96>}, {pipeline_mode = #tpu.pipeline_mode<synchronous>, transform_indices = @transform_4, window_bounds = array<i64: 1, 96>}, {transform_indices = @transform_5, window_bounds = array<i64: 1, 4, 8, 8>}, {transform_indices = @transform_6, window_bounds = array<i64: 1, 4, 8, 8>}, {transform_indices = @transform_7, window_bounds = array<i64: 1, 4, 8, 8>}]} {
    %c0 = arith.constant 0 : index
    %c0_0 = arith.constant 0 : index
    %c0_1 = arith.constant 0 : index
    %0 = vector.load %arg2[%c0, %c0_0, %c0_1] : memref<1x8x32xf32, #tpu.memory_space<vmem>>, vector<1x8x32xf32>
    %1 = vector.shape_cast %0 : vector<1x8x32xf32> to vector<8x32xf32>
    %c0_2 = arith.constant 0 : index
    %c0_3 = arith.constant 0 : index
    %2 = vector.load %arg3[%c0_2, %c0_3] : memref<1x32xf32, #tpu.memory_space<vmem>>, vector<1x32xf32>
    %c0_4 = arith.constant 0 : index
    %c0_5 = arith.constant 0 : index
    %3 = vector.load %arg4[%c0_4, %c0_5] : memref<1x32xf32, #tpu.memory_space<vmem>>, vector<1x32xf32>
    %cst = arith.constant dense<0.000000e+00> : vector<8xf32>
    %4 = vector.multi_reduction <add>, %1, %cst [1] : vector<8x32xf32> to vector<8xf32>
    %5 = vector.shape_cast %4 : vector<8xf32> to vector<8x1xf32>
    %cst_6 = arith.constant 3.200000e+01 : f32
    %6 = vector.broadcast %cst_6 : f32 to vector<8x1xf32>
    %7 = arith.divf %5, %6 : vector<8x1xf32>
    %8 = vector.broadcast %7 : vector<8x1xf32> to vector<8x32xf32>
    %9 = arith.subf %1, %8 : vector<8x32xf32>
    %10 = arith.mulf %9, %9 : vector<8x32xf32>
    %cst_7 = arith.constant dense<0.000000e+00> : vector<8xf32>
    %11 = vector.multi_reduction <add>, %10, %cst_7 [1] : vector<8x32xf32> to vector<8xf32>
    %12 = vector.shape_cast %11 : vector<8xf32> to vector<8x1xf32>
    %cst_8 = arith.constant 3.200000e+01 : f32
    %13 = vector.broadcast %cst_8 : f32 to vector<8x1xf32>
    %14 = arith.divf %12, %13 : vector<8x1xf32>
    %cst_9 = arith.constant 9.99999974E-6 : f32
    %15 = vector.broadcast %cst_9 : f32 to vector<8x1xf32>
    %16 = arith.addf %14, %15 : vector<8x1xf32>
    %17 = math.rsqrt %16 : vector<8x1xf32>
    %18 = vector.broadcast %17 : vector<8x1xf32> to vector<8x32xf32>
    %19 = arith.mulf %9, %18 : vector<8x32xf32>
    %20 = vector.broadcast %2 : vector<1x32xf32> to vector<8x32xf32>
    %21 = arith.mulf %19, %20 : vector<8x32xf32>
    %22 = vector.broadcast %3 : vector<1x32xf32> to vector<8x32xf32>
    %23 = arith.addf %21, %22 : vector<8x32xf32>
    %24 = arith.truncf %23 : vector<8x32xf32> to vector<8x32xbf16>
    %c0_10 = arith.constant 0 : index
    %c0_11 = arith.constant 0 : index
    %25 = vector.load %arg5[%c0_10, %c0_11] : memref<32x96xbf16, #tpu.memory_space<vmem>>, vector<32x96xbf16>
    %cst_12 = arith.constant dense<0.000000e+00> : vector<8x96xf32>
    %26 = tpu.matmul %24, %25, %cst_12 {dimension_numbers = #tpu.dot_dimension_numbers<[1], [0], [0], [1], [0, 0, 1, 1], [], []>} : vector<8x32xbf16>, vector<32x96xbf16>, vector<8x96xf32> -> vector<8x96xf32>
    %c0_13 = arith.constant 0 : index
    %c0_14 = arith.constant 0 : index
    %27 = vector.load %arg6[%c0_13, %c0_14] : memref<1x96xf32, #tpu.memory_space<vmem>>, vector<1x96xf32>
    %28 = vector.broadcast %27 : vector<1x96xf32> to vector<8x96xf32>
    %29 = arith.addf %26, %28 : vector<8x96xf32>
    %30 = vector.extract_strided_slice %29 {offsets = [0, 0], sizes = [8, 8], strides = [1, 1]} : vector<8x96xf32> to vector<8x8xf32>
    %cst_15 = arith.constant 0.353553385 : f32
    %31 = vector.broadcast %cst_15 : f32 to vector<8x8xf32>
    %32 = arith.mulf %30, %31 : vector<8x8xf32>
    %33 = arith.truncf %32 : vector<8x8xf32> to vector<8x8xbf16>
    %c0_16 = arith.constant 0 : index
    %c0_17 = arith.constant 0 : index
    %c0_18 = arith.constant 0 : index
    %c0_19 = arith.constant 0 : index
    %34 = vector.load %arg7[%c0_16, %c0_17, %c0_18, %c0_19] : memref<1x4x8x8xbf16, #tpu.memory_space<vmem>>, vector<1x1x8x8xbf16>
    %35 = vector.shape_cast %34 : vector<1x1x8x8xbf16> to vector<8x8xbf16>
    %36 = vector.shape_cast %33 : vector<8x8xbf16> to vector<1x1x8x8xbf16>
    tpu.vector_store %arg7[%c0_16, %c0_17, %c0_18, %c0_19], %36 {strides = array<i32>} : memref<1x4x8x8xbf16, #tpu.memory_space<vmem>>, vector<1x1x8x8xbf16>,
    %37 = vector.extract_strided_slice %29 {offsets = [0, 32], sizes = [8, 8], strides = [1, 1]} : vector<8x96xf32> to vector<8x8xf32>
    %38 = arith.truncf %37 : vector<8x8xf32> to vector<8x8xbf16>
    %c0_20 = arith.constant 0 : index
    %c0_21 = arith.constant 0 : index
    %c0_22 = arith.constant 0 : index
    %c0_23 = arith.constant 0 : index
    %39 = vector.load %arg8[%c0_20, %c0_21, %c0_22, %c0_23] : memref<1x4x8x8xbf16, #tpu.memory_space<vmem>>, vector<1x1x8x8xbf16>
    %40 = vector.shape_cast %39 : vector<1x1x8x8xbf16> to vector<8x8xbf16>
    %41 = vector.shape_cast %38 : vector<8x8xbf16> to vector<1x1x8x8xbf16>
    tpu.vector_store %arg8[%c0_20, %c0_21, %c0_22, %c0_23], %41 {strides = array<i32>} : memref<1x4x8x8xbf16, #tpu.memory_space<vmem>>, vector<1x1x8x8xbf16>,
    %42 = vector.extract_strided_slice %29 {offsets = [0, 64], sizes = [8, 8], strides = [1, 1]} : vector<8x96xf32> to vector<8x8xf32>
    %43 = arith.truncf %42 : vector<8x8xf32> to vector<8x8xbf16>
    %c0_24 = arith.constant 0 : index
    %c0_25 = arith.constant 0 : index
    %c0_26 = arith.constant 0 : index
    %c0_27 = arith.constant 0 : index
    %44 = vector.load %arg9[%c0_24, %c0_25, %c0_26, %c0_27] : memref<1x4x8x8xbf16, #tpu.memory_space<vmem>>, vector<1x1x8x8xbf16>
    %45 = vector.shape_cast %44 : vector<1x1x8x8xbf16> to vector<8x8xbf16>
    %46 = vector.shape_cast %43 : vector<8x8xbf16> to vector<1x1x8x8xbf16>
    tpu.vector_store %arg9[%c0_24, %c0_25, %c0_26, %c0_27], %46 {strides = array<i32>} : memref<1x4x8x8xbf16, #tpu.memory_space<vmem>>, vector<1x1x8x8xbf16>,
    %47 = vector.extract_strided_slice %29 {offsets = [0, 8], sizes = [8, 8], strides = [1, 1]} : vector<8x96xf32> to vector<8x8xf32>
    %cst_28 = arith.constant 0.353553385 : f32
    %48 = vector.broadcast %cst_28 : f32 to vector<8x8xf32>
    %49 = arith.mulf %47, %48 : vector<8x8xf32>
    %50 = arith.truncf %49 : vector<8x8xf32> to vector<8x8xbf16>
    %c0_29 = arith.constant 0 : index
    %c1 = arith.constant 1 : index
    %c0_30 = arith.constant 0 : index
    %c0_31 = arith.constant 0 : index
    %51 = vector.load %arg7[%c0_29, %c1, %c0_30, %c0_31] : memref<1x4x8x8xbf16, #tpu.memory_space<vmem>>, vector<1x1x8x8xbf16>
    %52 = vector.shape_cast %51 : vector<1x1x8x8xbf16> to vector<8x8xbf16>
    %53 = vector.shape_cast %50 : vector<8x8xbf16> to vector<1x1x8x8xbf16>
    tpu.vector_store %arg7[%c0_29, %c1, %c0_30, %c0_31], %53 {strides = array<i32>} : memref<1x4x8x8xbf16, #tpu.memory_space<vmem>>, vector<1x1x8x8xbf16>,
    %54 = vector.extract_strided_slice %29 {offsets = [0, 40], sizes = [8, 8], strides = [1, 1]} : vector<8x96xf32> to vector<8x8xf32>
    %55 = arith.truncf %54 : vector<8x8xf32> to vector<8x8xbf16>
    %c0_32 = arith.constant 0 : index
    %c1_33 = arith.constant 1 : index
    %c0_34 = arith.constant 0 : index
    %c0_35 = arith.constant 0 : index
    %56 = vector.load %arg8[%c0_32, %c1_33, %c0_34, %c0_35] : memref<1x4x8x8xbf16, #tpu.memory_space<vmem>>, vector<1x1x8x8xbf16>
    %57 = vector.shape_cast %56 : vector<1x1x8x8xbf16> to vector<8x8xbf16>
    %58 = vector.shape_cast %55 : vector<8x8xbf16> to vector<1x1x8x8xbf16>
    tpu.vector_store %arg8[%c0_32, %c1_33, %c0_34, %c0_35], %58 {strides = array<i32>} : memref<1x4x8x8xbf16, #tpu.memory_space<vmem>>, vector<1x1x8x8xbf16>,
    %59 = vector.extract_strided_slice %29 {offsets = [0, 72], sizes = [8, 8], strides = [1, 1]} : vector<8x96xf32> to vector<8x8xf32>
    %60 = arith.truncf %59 : vector<8x8xf32> to vector<8x8xbf16>
    %c0_36 = arith.constant 0 : index
    %c1_37 = arith.constant 1 : index
    %c0_38 = arith.constant 0 : index
    %c0_39 = arith.constant 0 : index
    %61 = vector.load %arg9[%c0_36, %c1_37, %c0_38, %c0_39] : memref<1x4x8x8xbf16, #tpu.memory_space<vmem>>, vector<1x1x8x8xbf16>
    %62 = vector.shape_cast %61 : vector<1x1x8x8xbf16> to vector<8x8xbf16>
    %63 = vector.shape_cast %60 : vector<8x8xbf16> to vector<1x1x8x8xbf16>
    tpu.vector_store %arg9[%c0_36, %c1_37, %c0_38, %c0_39], %63 {strides = array<i32>} : memref<1x4x8x8xbf16, #tpu.memory_space<vmem>>, vector<1x1x8x8xbf16>,
    %64 = vector.extract_strided_slice %29 {offsets = [0, 16], sizes = [8, 8], strides = [1, 1]} : vector<8x96xf32> to vector<8x8xf32>
    %cst_40 = arith.constant 0.353553385 : f32
    %65 = vector.broadcast %cst_40 : f32 to vector<8x8xf32>
    %66 = arith.mulf %64, %65 : vector<8x8xf32>
    %67 = arith.truncf %66 : vector<8x8xf32> to vector<8x8xbf16>
    %c0_41 = arith.constant 0 : index
    %c2 = arith.constant 2 : index
    %c0_42 = arith.constant 0 : index
    %c0_43 = arith.constant 0 : index
    %68 = vector.load %arg7[%c0_41, %c2, %c0_42, %c0_43] : memref<1x4x8x8xbf16, #tpu.memory_space<vmem>>, vector<1x1x8x8xbf16>
    %69 = vector.shape_cast %68 : vector<1x1x8x8xbf16> to vector<8x8xbf16>
    %70 = vector.shape_cast %67 : vector<8x8xbf16> to vector<1x1x8x8xbf16>
    tpu.vector_store %arg7[%c0_41, %c2, %c0_42, %c0_43], %70 {strides = array<i32>} : memref<1x4x8x8xbf16, #tpu.memory_space<vmem>>, vector<1x1x8x8xbf16>,
    %71 = vector.extract_strided_slice %29 {offsets = [0, 48], sizes = [8, 8], strides = [1, 1]} : vector<8x96xf32> to vector<8x8xf32>
    %72 = arith.truncf %71 : vector<8x8xf32> to vector<8x8xbf16>
    %c0_44 = arith.constant 0 : index
    %c2_45 = arith.constant 2 : index
    %c0_46 = arith.constant 0 : index
    %c0_47 = arith.constant 0 : index
    %73 = vector.load %arg8[%c0_44, %c2_45, %c0_46, %c0_47] : memref<1x4x8x8xbf16, #tpu.memory_space<vmem>>, vector<1x1x8x8xbf16>
    %74 = vector.shape_cast %73 : vector<1x1x8x8xbf16> to vector<8x8xbf16>
    %75 = vector.shape_cast %72 : vector<8x8xbf16> to vector<1x1x8x8xbf16>
    tpu.vector_store %arg8[%c0_44, %c2_45, %c0_46, %c0_47], %75 {strides = array<i32>} : memref<1x4x8x8xbf16, #tpu.memory_space<vmem>>, vector<1x1x8x8xbf16>,
    %76 = vector.extract_strided_slice %29 {offsets = [0, 80], sizes = [8, 8], strides = [1, 1]} : vector<8x96xf32> to vector<8x8xf32>
    %77 = arith.truncf %76 : vector<8x8xf32> to vector<8x8xbf16>
    %c0_48 = arith.constant 0 : index
    %c2_49 = arith.constant 2 : index
    %c0_50 = arith.constant 0 : index
    %c0_51 = arith.constant 0 : index
    %78 = vector.load %arg9[%c0_48, %c2_49, %c0_50, %c0_51] : memref<1x4x8x8xbf16, #tpu.memory_space<vmem>>, vector<1x1x8x8xbf16>
    %79 = vector.shape_cast %78 : vector<1x1x8x8xbf16> to vector<8x8xbf16>
    %80 = vector.shape_cast %77 : vector<8x8xbf16> to vector<1x1x8x8xbf16>
    tpu.vector_store %arg9[%c0_48, %c2_49, %c0_50, %c0_51], %80 {strides = array<i32>} : memref<1x4x8x8xbf16, #tpu.memory_space<vmem>>, vector<1x1x8x8xbf16>,
    %81 = vector.extract_strided_slice %29 {offsets = [0, 24], sizes = [8, 8], strides = [1, 1]} : vector<8x96xf32> to vector<8x8xf32>
    %cst_52 = arith.constant 0.353553385 : f32
    %82 = vector.broadcast %cst_52 : f32 to vector<8x8xf32>
    %83 = arith.mulf %81, %82 : vector<8x8xf32>
    %84 = arith.truncf %83 : vector<8x8xf32> to vector<8x8xbf16>
    %c0_53 = arith.constant 0 : index
    %c3 = arith.constant 3 : index
    %c0_54 = arith.constant 0 : index
    %c0_55 = arith.constant 0 : index
    %85 = vector.load %arg7[%c0_53, %c3, %c0_54, %c0_55] : memref<1x4x8x8xbf16, #tpu.memory_space<vmem>>, vector<1x1x8x8xbf16>
    %86 = vector.shape_cast %85 : vector<1x1x8x8xbf16> to vector<8x8xbf16>
    %87 = vector.shape_cast %84 : vector<8x8xbf16> to vector<1x1x8x8xbf16>
    tpu.vector_store %arg7[%c0_53, %c3, %c0_54, %c0_55], %87 {strides = array<i32>} : memref<1x4x8x8xbf16, #tpu.memory_space<vmem>>, vector<1x1x8x8xbf16>,
    %88 = vector.extract_strided_slice %29 {offsets = [0, 56], sizes = [8, 8], strides = [1, 1]} : vector<8x96xf32> to vector<8x8xf32>
    %89 = arith.truncf %88 : vector<8x8xf32> to vector<8x8xbf16>
    %c0_56 = arith.constant 0 : index
    %c3_57 = arith.constant 3 : index
    %c0_58 = arith.constant 0 : index
    %c0_59 = arith.constant 0 : index
    %90 = vector.load %arg8[%c0_56, %c3_57, %c0_58, %c0_59] : memref<1x4x8x8xbf16, #tpu.memory_space<vmem>>, vector<1x1x8x8xbf16>
    %91 = vector.shape_cast %90 : vector<1x1x8x8xbf16> to vector<8x8xbf16>
    %92 = vector.shape_cast %89 : vector<8x8xbf16> to vector<1x1x8x8xbf16>
    tpu.vector_store %arg8[%c0_56, %c3_57, %c0_58, %c0_59], %92 {strides = array<i32>} : memref<1x4x8x8xbf16, #tpu.memory_space<vmem>>, vector<1x1x8x8xbf16>,
    %93 = vector.extract_strided_slice %29 {offsets = [0, 88], sizes = [8, 8], strides = [1, 1]} : vector<8x96xf32> to vector<8x8xf32>
    %94 = arith.truncf %93 : vector<8x8xf32> to vector<8x8xbf16>
    %c0_60 = arith.constant 0 : index
    %c3_61 = arith.constant 3 : index
    %c0_62 = arith.constant 0 : index
    %c0_63 = arith.constant 0 : index
    %95 = vector.load %arg9[%c0_60, %c3_61, %c0_62, %c0_63] : memref<1x4x8x8xbf16, #tpu.memory_space<vmem>>, vector<1x1x8x8xbf16>
    %96 = vector.shape_cast %95 : vector<1x1x8x8xbf16> to vector<8x8xbf16>
    %97 = vector.shape_cast %94 : vector<8x8xbf16> to vector<1x1x8x8xbf16>
    tpu.vector_store %arg9[%c0_60, %c3_61, %c0_62, %c0_63], %97 {strides = array<i32>} : memref<1x4x8x8xbf16, #tpu.memory_space<vmem>>, vector<1x1x8x8xbf16>,
    return
  }
  func.func @transform_0(%arg0: i32, %arg1: i32) -> (i32, i32, i32) {
    %c0_i32 = arith.constant 0 : i32
    %c0_i32_0 = arith.constant 0 : i32
    return %arg0, %arg1, %c0_i32 : i32, i32, i32
  }
  func.func @transform_1(%arg0: i32, %arg1: i32) -> (i32, i32) {
    %c0_i32 = arith.constant 0 : i32
    %c0_i32_0 = arith.constant 0 : i32
    %c0_i32_1 = arith.constant 0 : i32
    return %c0_i32, %c0_i32_0 : i32, i32
  }
  func.func @transform_2(%arg0: i32, %arg1: i32) -> (i32, i32) {
    %c0_i32 = arith.constant 0 : i32
    %c0_i32_0 = arith.constant 0 : i32
    %c0_i32_1 = arith.constant 0 : i32
    return %c0_i32, %c0_i32_0 : i32, i32
  }
  func.func @transform_3(%arg0: i32, %arg1: i32) -> (i32, i32) {
    %c0_i32 = arith.constant 0 : i32
    %c0_i32_0 = arith.constant 0 : i32
    %c0_i32_1 = arith.constant 0 : i32
    return %c0_i32, %c0_i32_0 : i32, i32
  }
  func.func @transform_4(%arg0: i32, %arg1: i32) -> (i32, i32) {
    %c0_i32 = arith.constant 0 : i32
    %c0_i32_0 = arith.constant 0 : i32
    %c0_i32_1 = arith.constant 0 : i32
    return %c0_i32, %c0_i32_0 : i32, i32
  }
  func.func @transform_5(%arg0: i32, %arg1: i32) -> (i32, i32, i32, i32) {
    %c0_i32 = arith.constant 0 : i32
    %c0_i32_0 = arith.constant 0 : i32
    %c0_i32_1 = arith.constant 0 : i32
    return %arg0, %c0_i32, %arg1, %c0_i32_0 : i32, i32, i32, i32
  }
  func.func @transform_6(%arg0: i32, %arg1: i32) -> (i32, i32, i32, i32) {
    %c0_i32 = arith.constant 0 : i32
    %c0_i32_0 = arith.constant 0 : i32
    %c0_i32_1 = arith.constant 0 : i32
    return %arg0, %c0_i32, %arg1, %c0_i32_0 : i32, i32, i32, i32
  }
  func.func @transform_7(%arg0: i32, %arg1: i32) -> (i32, i32, i32, i32) {
    %c0_i32 = arith.constant 0 : i32
    %c0_i32_0 = arith.constant 0 : i32
    %c0_i32_1 = arith.constant 0 : i32
    return %arg0, %c0_i32, %arg1, %c0_i32_0 : i32, i32, i32, i32
  }
}

</mosaic_0001>

<bundles_post_ra>
// kernel: tpu_custom_call.1
= control target key start
LH: loop header
LB: loop body
LE: loop exit
PB: predicated region body
PF: predicated region fallthrough
CT: control target
= control target key end

     0   :  { %s1410_s0 = inlined_call_operand.hbm [shape: f32[2,32,32], index: 0, kind: input, shape index: {}]   ;;  %s1411_s1 = inlined_call_operand.vmem [shape: f32[1,32], index: 1, kind: input, shape index: {}]   ;;  %s1412_s2 = inlined_call_operand.vmem [shape: f32[1,32], index: 2, kind: input, shape index: {}]   ;;  %s1413_s3 = inlined_call_operand.hbm [shape: bf16[32,96], index: 3, kind: input, shape index: {}]   ;;  %s1414_s4 = inlined_call_operand.vmem [shape: f32[1,96], index: 4, kind: input, shape index: {}]   ;;  %s1415_s5 = inlined_call_operand.vmem [shape: bf16[2,4,32,8], index: 5, kind: output, shape index: {0}]   ;;  %s1416_s6 = inlined_call_operand.vmem [shape: bf16[2,4,32,8], index: 6, kind: output, shape index: {1}]   ;;  %s1417_s7 = inlined_call_operand.vmem [shape: bf16[2,4,32,8], index: 7, kind: output, shape index: {2}]  }
   0x1   :  { %1419 = sst [smem:[#allocation14_spill]] %s1413_s3 }
   0x2   :  { %1420 = sst [smem:[#allocation15_spill]] %s1415_s5 }
   0x3   :  { %1421 = sst [smem:[#allocation16_spill]] %s1416_s6 }
   0x4   :  { %1422 = sst [smem:[#allocation17_spill]] %s1417_s7 }
   0x5   :  { %13 = vsyncpa [#allocation3], 0 }
   0x6   :  { %15 = vsyncpa [#allocation3 + $0x1], 0 }
   0x7   :  { %16 = vsyncpa [#allocation5], 0  ;;  %s1182_s24 = smov 0   ;;  %s1184_s25 = smov 0  }
   0x8   :  { %s1186_s26 = smov 0   ;;  %s1188_s27 = smov 0  }
   0x9   :  { %s1190_s28 = smov 0   ;;  %s1192_s29 = smov 0  }
   0xa   :  { %s1194_s30 = smov 0   ;;  %s1196_s8 = smov 0  }
   0xb LB: > { %1423 = sst [smem:[#allocation11_spill]] %s1107_s27  ;;  %s843_s9 = sadd.s32 4294967295, %s1123_s8   ;;  %s1123_s8 = sphi %s1196_s8, %s22_s8   ;;  %s1119_s30 = sphi %s1194_s30, %s1452_s30   ;;  %s1115_s29 = sphi %s1192_s29, %s1451_s29   ;;  %s1111_s28 = sphi %s1190_s28, %s1450_s28   ;;  %s1107_s27 = sphi %s1188_s27, %s1449_s27   ;;  %s1103_s26 = sphi %s1186_s26, %s1448_s26   ;;  %s1099_s25 = sphi %s1184_s25, %s1447_s25   ;;  %s1095_s24 = sphi %s1182_s24, %s1446_s24  }
   0xc   : > { %1424 = sst [smem:[#allocation12_spill]] %s1111_s28  ;;  %p56_p0 = scmp.ne.s32.totalorder %s1099_s25, %s1095_s24 }
   0xd   : > { %p1222_p1 = scmp.eq.s32.totalorder %s843_s9, 0  ;;  %p845_p2 = scmp.ge.s32.totalorder %s1123_s8, 1 }
   0xe   : > { %p235_p3 = scmp.lt.s32.totalorder %s1123_s8, 9  ;;  %s1125_s13 = smov [#allocation4]  }
   0xf   : > { %p1230_p4 = por %p1222_p1, %p56_p0  ;;  %s253_s14 = sshll.u32 %s1125_s13, 4  ;;  %s254_s14 = int_to_ptr.vmem [resolvable:$true] %s253_s14 }
  0x10   : > { %p1234_p5 = pnand %p845_p2, %p235_p3  ;;  %s1010_s15 = scalar_lea.vmem %s254_s14, 256 }
  0x11   : > { %p1011_p9 = scmp.ne.s32.totalorder %s254_s14, %s1010_s15  ;;  %p1018_p12 = scmp.lt.s32.totalorder %s254_s14, %s254_s14 }
  0x12   : > { %p904_p6 = pneg %p1234_p5  ;;  %p1019_p13 = scmp.lt.s32.totalorder %s1010_s15, %s1010_s15 }
  0x14   : > { %p905_p7 = pnand %p904_p6, %p1222_p1  ;;  %p1020_p0 = por %p1019_p13, %p1018_p12 }
  0x16   : > { %p1001_p8 = pneg %p905_p7 }
  0x18   : > { %p1013_p10 = pnand %p1011_p9, %p1001_p8 }
  0x1a   : > { %p1014_p11 = pneg %p1013_p10 }
  0x1c   : > { %p1021_p2 = pnand %p1020_p0, %p1014_p11 }
  0x1e   : > { %1024 = shalt.err (!%p1021_p2)
}
  0x1f   : > { %s1126_s16 = smov 64   ;;  %s1127_s17 = smov 4  }
  0x20   : > { %s1428_s3 = sld [smem:[#allocation14_spill]]  ;;  %p166_p3 = scmp.eq.s32.totalorder %s843_s9, 7 }
  0x21   : > { %s31_s20 = sadd.s32 1, %s1115_s29  ;;  %s34_s21 = sadd.s32 1, %s1119_s30 }
  0x22   : > { %p32_p6 = scmp.ge.s32.totalorder %s31_s20, 4  ;;  %p50_p8 = scmp.ne.s32.totalorder %s1103_s26, %s1099_s25 }
  0x23   : > { %p51_p9 = scmp.eq.s32.totalorder %s1123_s8, 0  ;;  %s43_s23 = sadd.s32 1, %s1103_s26 }
  0x24   : > { %s1454_s20 = smov (%p32_p6, %s31_s20), 0  ;;  %s1456_s21 = smov (!%p32_p6, %s34_s21), %s1119_s30 }
  0x25   : > { %1429 = sst [smem:[#allocation13_spill]] %s1454_s20  ;;  %s39_s22 = ssub.s32 %s1115_s29, %s1454_s20 }
  0x26   : > { %907 = dma.hbm_to_vmem [thread:$0]  (!%p905_p7), %s1428_s3, 256, %s254_s14, [#allocation5], %s1126_s16, %s1126_s16, %s1127_s17  }
  0x27   : > { %p36_p10 = scmp.ge.s32.totalorder %s1456_s21, 2  ;;  %p1256_p11 = por %p166_p3, %p50_p8 }
  0x28   : > { %p1260_p7 = por %p51_p9, %p50_p8  ;;  %s270_s13 = sand.u32 1, %s1103_s26  }
  0x29   : > { %s1430_s24 = scalar_select %p1256_p11, 1, 0 }
  0x2a   : > { %s1458_s21 = smov (%p36_p10, %s1456_s21), 0  ;;  %p913_p12 = scmp.lt.s32.totalorder %s1123_s8, 8 }
  0x2b   : > { %s848_s14 = sshll.u32 %s270_s13, 3  ;;  %s38_s15 = ssub.s32 %s1119_s30, %s1458_s21 }
  0x2c   : > { %s40_s16 = sor.u32 %s39_s22, %s38_s15  ;;  %s849_s17 = sshll.u32 %s1119_s30, 2 }
  0x2d   : > { %p41_p13 = scmp.eq.s32.totalorder %s40_s16, 0  ;;  %s279_s18 = sadd.s32 %s1115_s29, %s849_s17 }
  0x2e   : > { %s850_s19 = sshll.u32 %s279_s18, 7  ;;  %s274_s3 = scalar_lea.vmem [#allocation2], %s848_s14 }
  0x2f   : > { %s283_s20 = sshll.u32 %s274_s3, 4  ;;  %s281_s27 = scalar_lea.hbm %s1410_s0, %s850_s19  ;;  %s284_s20 = int_to_ptr.vmem [resolvable:$true] %s283_s20 }
  0x30   : > { %s1273_s7 = scalar_select %p41_p13, %s1103_s26, %s43_s23  }
  0x31   : > { %p1282_p0 = pnand %p913_p12, %p1260_p7  ;;  %s271_s22 = scalar_lea.sflag [#allocation3], %s270_s13 }
  0x32   : > { %s1038_s15 = scalar_lea.vmem %s284_s20, 128  ;;  %s1128_s3 = smov [#allocation2]  }
  0x33   : > { %p1027_p2 = pneg %p1282_p0  ;;  %p1039_p3 = scmp.ne.s32.totalorder %s284_s20, %s1038_s15 }
  0x34   : > { %s1043_s23 = sshll.u32 %s1128_s3, 4  ;;  %s1044_s23 = int_to_ptr.vmem [resolvable:$false] %s1043_s23 }
  0x35   : > { %p1041_p6 = pnand %p1039_p3, %p1027_p2  ;;  %s1045_s5 = scalar_lea.vmem %s1044_s23, 256 }
  0x36   : > { %p1046_p9 = scmp.lt.s32.totalorder %s284_s20, %s1044_s23  ;;  %p1047_p10 = scmp.lt.s32.totalorder %s1045_s5, %s1038_s15 }
  0x37   : > { %p1042_p8 = pneg %p1041_p6 }
  0x38   : > { %p1048_p13 = por %p1047_p10, %p1046_p9 }
  0x3a   : > { %p1049_p11 = pnand %p1048_p13, %p1042_p8 }
  0x3c   : > { %1052 = shalt.err (!%p1049_p11)
}
  0x3d   : > { %911 = dma.hbm_to_vmem [thread:$0]  (!%p1282_p0), %s281_s27, 128, %s284_s20, %s271_s22  }
  0x3e   : > { %292 = sbr.rel (%p1234_p5) target bundleno = 756 (0x2f4), region = 40  ;;  %s1293_s6 = sand.u32 (!%p1234_p5), 1, %s1099_s25  }
  0x3f   : > { %s852_s9 = sshll.u32 (!%p1234_p5), %s1293_s6, 3  ;;  %s295_s13 = scalar_lea.sflag (!%p1234_p5), [#allocation3], %s1293_s6 }
  0x40   : > { %s298_s14 = scalar_lea.vmem (!%p1234_p5), [#allocation2], %s852_s9 }
  0x43   : > { %1086 = dma.done.wait (%p1230_p4), %s295_s13, 128  }
  0x44   : > { %1088 = vsyncadd (%p1230_p4), %s295_s13, 4294967168 }
  0x45   : > { %1090 = dma.done.wait (%p1222_p1), [#allocation5], 256  }
  0x46   : > { %1092 = vsyncadd (%p1222_p1), [#allocation5], 4294967040  ;;  %vm344_vm0 = vcmask 261120   ;;  %v341_v0 = vld [vmem:[%s298_s14] sm:$0xff]  ;;  %v995_v7 = vld [vmem:[#allocation4 + $0x8] sm:$0xff]   ;;  %v1129_v8 = vmov 0.0  }
  0x47   : > { %v345_v1 = vsel %vm344_vm0, %v341_v0, 0.0  ;;  %890 = vmatprep.subr.bf16.mxu0 %v1129_v8  ;;  %vm1130_vm1 = vmmov 0   ;;  %v996_v9 = vld [vmem:[#allocation4] sm:$0xff]   ;;  %v857_v14 = vld [vmem:[%s1411_s1] ss:$0 sm:$0xff]  ;;  %s1318_s16 = sshll.u32 %s1293_s6, 4 }
  0x48   : > { %346 = vadd.xlane.f32.xlu0 %v345_v1  ;;  %894 = vmatprep.mubr.msk.bf16.mxu0 %vm1130_vm1, %v1129_v8  ;;  %v858_v16 = vld [vmem:[%s1412_s2] ss:$0 sm:$0xff]  ;;  %vm442_vm2 = vcmask 60416   ;;  %s1131_s17 = smov 96   ;;  %s1132_s18 = smov 120  }
  0x49   : > { %891 = vmatpush3.bf16.msra.mxu0 %v995_v7  ;;  %v859_v20 = vld [vmem:[%s1414_s4] ss:$0 sm:$0xff]  ;;  %s1321_s19 = scalar_lea.vmem [#allocation6], %s1318_s16  ;;  %s1133_s22 = smov 64  }
  0x4a   : > { %892 = vmatprep.subr.bf16.mxu0 %v1129_v8  ;;  %s1134_s15 = smov 72   ;;  %s1135_s3 = smov 88  }
  0x4b   : > { %s1136_s23 = smov 56   ;;  %s1137_s5 = smov 80  }
  0x4c   : > { %s1138_s6 = smov 48   ;;  %s1139_s9 = smov 112  }
  0x4d   : > { %893 = vmatpush3.bf16.msra.mxu0 %v996_v9  ;;  %s1140_s13 = smov 104   ;;  %s1141_s14 = smov 40  }
  0x4e   : > { %s1326_s27 = scalar_lea.vmem [#allocation7], %s1318_s16  ;;  %s1333_s28 = scalar_lea.vmem [#allocation8], %s1318_s16 }
  0x4f   : > { %p1433_p1 = scmp.ne.s32.totalorder %s1430_s24, 0 }
  0x50   : > { %s1434_s10 = sld [smem:[#allocation12_spill]] (%p1433_p1) }
  0x51   : > { %s1435_s11 = sld [smem:[#allocation11_spill]] (%p1433_p1) }
  0x56   : > { %s877_s12 = sshll.u32 (%p1433_p1), %s1434_s10, 4 }
  0x57   : > { %s520_s20 = sadd.s32 (%p1433_p1), %s1435_s11, %s877_s12 }
  0x58   : > { %s878_s16 = sshll.u32 (%p1433_p1), %s520_s20, 2 }
  0xd1   : > { %v347_v2 = vpop.xlane.xlu0 %346 }
  0xd2   : > { %v349_v3 = vmul.f32 0.03125, %v347_v2 }
  0xd4   : > { %v350_v4 = vsub.f32 %v341_v0, %v349_v3 }
  0xd6   : > { %v351_v5 = vmul.f32 %v350_v4, %v350_v4 }
  0xd8   : > { %v352_v6 = vsel %vm344_vm0, %v351_v5, 0.0 }
  0xd9   : > { %353 = vadd.xlane.f32.xlu0 %v352_v6 }
 0x162   : > { %v354_v10 = vpop.xlane.xlu0 %353 }
 0x163   : > { %v355_v11 = vmul.f32 0.03125, %v354_v10 }
 0x165   : > { %v356_v12 = vadd.f32 1e-05, %v355_v11 }
 0x167   : > { %997 = vrsqrt.f32 %v356_v12 }
 0x174   : > { %v998_v13 = vpop.eup %997 }
 0x175   : > { %v358_v15 = vmul.f32 %v998_v13, %v350_v4 }
 0x177   : > { %v365_v17 = vmul.f32 %v857_v14, %v358_v15 }
 0x179   : > { %v372_v18 = vadd.f32 %v858_v16, %v365_v17 }
 0x17b   : > { %v373_v19 = vpack.c.bf16 %v372_v18, %v372_v18 }
 0x17d   : > { %895 = vmatmul.mubr.msk.bf16.vlgmr.msra.gmra.mxu0 %vm344_vm0, %v373_v19 }
 0x23d   : > { %v434_v21 = vpop.f32.mrf.mxu0 }
 0x23e   : > { %v435_v22 = vadd.f32 %v859_v20, %v434_v21 }
 0x23f   : > { %v896_v23 = vpop.f32.mrf.mxu0 }
 0x240   : > { %v440_v24 = vmul.f32 0.35355338, %v435_v22  ;;  %v885_v25 = vpack.c.bf16 %v435_v22, %v435_v22 }
 0x241   : > { %v437_v26 = vpop.f32.mrf.mxu0 }
 0x242   : > { %v441_v27 = vpack.c.bf16 %v440_v24, %v440_v24  ;;  %448 = vrot.lane.b32.xlu1 %v885_v25, %s1131_s17 }
 0x243   : > { %v897_v28 = vpop.f32.mrf.mxu0 }
 0x244   : > { %459 = vrot.lane.b32.xlu0 %v441_v27, %s1132_s18  ;;  %443 = vst.msk [vmem:[%s1321_s19] sm:$0xf] %vm442_vm2, %v441_v27 }
 0x246   : > { %452 = vrot.lane.b32.xlu1 %v885_v25, %s1133_s22  ;;  %s1436_s22 = sld [smem:[#allocation15_spill]] (%p1433_p1) }
 0x248   : > { %494 = vrot.lane.b32.xlu0 %v885_v25, %s1134_s15 }
 0x24a   : > { %464 = vrot.lane.b32.xlu1 %v885_v25, %s1135_s3 }
 0x24b   : > { %v539_v40 = vld [vmem:[%s1321_s19] sm:$0xf] (%p1433_p1) }
 0x24c   : > { %s522_s15 = scalar_lea.vmem (%p1433_p1), %s1436_s22, %s878_s16 }
 0x24d   : > { %540 = vst [vmem:[%s522_s15] sm:$0xf] (%p1433_p1), %v539_v40 }
 0x24e   : > { %469 = vrot.lane.b32.xlu1 %v885_v25, %s1136_s23 }
 0x252   : > { %479 = vrot.lane.b32.xlu1 %v885_v25, %s1137_s5 }
 0x256   : > { %484 = vrot.lane.b32.xlu1 %v885_v25, %s1138_s6 }
 0x25a   : > { %474 = vrot.lane.b32.xlu1 %v441_v27, %s1139_s9 }
 0x25e   : > { %489 = vrot.lane.b32.xlu1 %v441_v27, %s1140_s13 }
 0x262   : > { %499 = vrot.lane.b32.xlu1 %v885_v25, %s1141_s14 }
 0x2b4   : > { %v449_v29 = vpop.permute.xlu1 %448 }
 0x2b5   : > { %451 = vst.msk [vmem:[%s1326_s27] sm:$0xf] %vm442_vm2, %v449_v29 }
 0x2b6   : > { %v460_v30 = vpop.permute.xlu0 %459 }
 0x2b7   : > { %865 = vst.msk [vmem:[%s1321_s19 + $0x4] sm:$0xf] %vm442_vm2, %v460_v30 }
 0x2b8   : > { %v453_v31 = vpop.permute.xlu1 %452 }
 0x2b9   : > { %455 = vst.msk [vmem:[%s1333_s28] sm:$0xf] %vm442_vm2, %v453_v31 }
 0x2ba   : > { %v495_v32 = vpop.permute.xlu0 %494 }
 0x2bb   : > { %872 = vst.msk [vmem:[%s1326_s27 + $0xc] sm:$0xf] %vm442_vm2, %v495_v32 }
 0x2bc   : > { %v465_v33 = vpop.permute.xlu1 %464 }
 0x2bd   : > { %866 = vst.msk [vmem:[%s1326_s27 + $0x4] sm:$0xf] %vm442_vm2, %v465_v33 }
 0x2be   : > { %v541_v41 = vld [vmem:[%s1321_s19 + $0x4] sm:$0xf] (%p1433_p1) }
 0x2bf   : > { %542 = vst [vmem:[%s522_s15 + $0x10] sm:$0xf] (%p1433_p1), %v541_v41 }
 0x2c0   : > { %v470_v34 = vpop.permute.xlu1 %469 }
 0x2c1   : > { %867 = vst.msk [vmem:[%s1333_s28 + $0x4] sm:$0xf] %vm442_vm2, %v470_v34 }
 0x2c4   : > { %v480_v35 = vpop.permute.xlu1 %479 }
 0x2c5   : > { %869 = vst.msk [vmem:[%s1326_s27 + $0x8] sm:$0xf] %vm442_vm2, %v480_v35 }
 0x2c8   : > { %v485_v36 = vpop.permute.xlu1 %484 }
 0x2c9   : > { %870 = vst.msk [vmem:[%s1333_s28 + $0x8] sm:$0xf] %vm442_vm2, %v485_v36 }
 0x2cc   : > { %v475_v37 = vpop.permute.xlu1 %474 }
 0x2cd   : > { %868 = vst.msk [vmem:[%s1321_s19 + $0x8] sm:$0xf] %vm442_vm2, %v475_v37 }
 0x2d0   : > { %v490_v38 = vpop.permute.xlu1 %489 }
 0x2d1   : > { %871 = vst.msk [vmem:[%s1321_s19 + $0xc] sm:$0xf] %vm442_vm2, %v490_v38  ;;  %518 = sbr.rel (!%p1433_p1) target bundleno = 730 (0x2da), region = 52 }
 0x2d4   : > { %v500_v39 = vpop.permute.xlu1 %499  ;;  %v543_v42 = vld [vmem:[%s1321_s19 + $0x8] sm:$0xf] (%p1433_p1) }
 0x2d5   : > { %873 = vst.msk [vmem:[%s1333_s28 + $0xc] sm:$0xf] %vm442_vm2, %v500_v39  ;;  %544 = vst [vmem:[%s522_s15 + $0x20] sm:$0xf] (%p1433_p1), %v543_v42 }
 0x2d8   : > { %v545_v43 = vld [vmem:[%s1321_s19 + $0xc] sm:$0xf] }
 0x2d9   : > { %546 = vst [vmem:[%s522_s15 + $0x30] sm:$0xf] %v545_v43 }
 0x2da PF: > { %p1437_p4 = scmp.ne.s32.totalorder %s1430_s24, 0 }
 0x2db   : > { %s1438_s3 = sld [smem:[#allocation12_spill]] (%p1437_p4)  ;;  %v599_v44 = vld [vmem:[%s1326_s27] sm:$0xf] (%p1437_p4)  ;;  %v601_v45 = vld [vmem:[%s1326_s27 + $0x4] sm:$0xf] (%p1437_p4) }
 0x2dc   : > { %578 = sbr.rel (!%p1437_p4) target bundleno = 743 (0x2e7), region = 93  ;;  %s1439_s23 = sld [smem:[#allocation11_spill]] (%p1437_p4)  ;;  %v603_v46 = vld [vmem:[%s1326_s27 + $0x8] sm:$0xf] (%p1437_p4)  ;;  %v605_v47 = vld [vmem:[%s1326_s27 + $0xc] sm:$0xf] (%p1437_p4) }
 0x2dd   : > { %s1440_s14 = sld [smem:[#allocation16_spill]] (%p1437_p4) }
 0x2e1   : > { %s879_s19 = sshll.u32 %s1438_s3, 4 }
 0x2e2   : > { %s580_s5 = sadd.s32 %s1439_s23, %s879_s19 }
 0x2e3   : > { %s880_s6 = sshll.u32 %s580_s5, 2 }
 0x2e4   : > { %s582_s10 = scalar_lea.vmem %s1440_s14, %s880_s6 }
 0x2e5   : > { %600 = vst [vmem:[%s582_s10] sm:$0xf] %v599_v44  ;;  %602 = vst [vmem:[%s582_s10 + $0x10] sm:$0xf] %v601_v45 }
 0x2e6   : > { %604 = vst [vmem:[%s582_s10 + $0x20] sm:$0xf] %v603_v46  ;;  %606 = vst [vmem:[%s582_s10 + $0x30] sm:$0xf] %v605_v47 }
 0x2e7 PF: > { %p1441_p5 = scmp.ne.s32.totalorder %s1430_s24, 0 }
 0x2e8   : > { %s1442_s11 = sld [smem:[#allocation12_spill]] (%p1441_p5)  ;;  %v659_v48 = vld [vmem:[%s1333_s28] sm:$0xf] (%p1441_p5)  ;;  %v661_v49 = vld [vmem:[%s1333_s28 + $0x4] sm:$0xf] (%p1441_p5) }
 0x2e9   : > { %638 = sbr.rel (!%p1441_p5) target bundleno = 756 (0x2f4), region = 134  ;;  %s1443_s12 = sld [smem:[#allocation11_spill]] (%p1441_p5)  ;;  %v663_v50 = vld [vmem:[%s1333_s28 + $0x8] sm:$0xf] (%p1441_p5)  ;;  %v665_v51 = vld [vmem:[%s1333_s28 + $0xc] sm:$0xf] (%p1441_p5) }
 0x2ea   : > { %s1444_s22 = sld [smem:[#allocation17_spill]] (%p1441_p5) }
 0x2ee   : > { %s881_s27 = sshll.u32 %s1442_s11, 4 }
 0x2ef   : > { %s640_s20 = sadd.s32 %s1443_s12, %s881_s27 }
 0x2f0   : > { %s882_s16 = sshll.u32 %s640_s20, 2 }
 0x2f1   : > { %s642_s15 = scalar_lea.vmem %s1444_s22, %s882_s16 }
 0x2f2   : > { %660 = vst [vmem:[%s642_s15] sm:$0xf] %v659_v48  ;;  %662 = vst [vmem:[%s642_s15 + $0x10] sm:$0xf] %v661_v49 }
 0x2f3   : > { %664 = vst [vmem:[%s642_s15 + $0x20] sm:$0xf] %v663_v50  ;;  %666 = vst [vmem:[%s642_s15 + $0x30] sm:$0xf] %v665_v51 }
 0x2f4 PF: > { %s22_s8 = sadd.s32 1, %s1123_s8   ;;  %s1445_s3 = sld [smem:[#allocation13_spill]] }
 0x2f5   : > { %p19_p11 = scmp.ge.s32.totalorder %s22_s8, 10   ;;  %s1446_s24 = smov %s1099_s25 }
 0x2f6   : > { %s1447_s25 = smov %s1103_s26  ;;  %s1448_s26 = smov %s1273_s7 }
 0x2f7   : > { %s1449_s27 = smov %s1115_s29  ;;  %s1450_s28 = smov %s1119_s30 }
 0x2f8   : > { %s1452_s30 = smov %s1458_s21  ;;  %21 = sbr.rel (!%p19_p11) target bundleno = 11 (0xb), region = 240 }
 0x2fa   : > { %s1451_s29 = smov %s1445_s3 }
 0x2fd   :  { %722 = vsyncpa [#allocation3], 1 }
 0x2fe   :  { %724 = vsyncpa [#allocation3 + $0x1], 1 }
 0x2ff   :  { %725 = vsyncpa [#allocation5], 1 }

</bundles_post_ra>
